<compile_context>
chip_gen: v7x
topology: tpu7x:2x2x1
jax: 0.10.0
libtpu: 0.0.40
codegen_flags: <defaults>
</compile_context>

<pallas_src>
import jax
import jax.numpy as jnp
from jax.experimental import pallas as pl
from jax.experimental.pallas import tpu as pltpu

_LANES = 128


def _round_up(a: int, b: int) -> int:
    return -(-a // b) * b


def _hard_sigmoid_jnp(x):
    return jnp.clip(x + 3.0, 0.0, 6.0) * (1.0 / 6.0)


def _hard_sigmoid_kernel(x_ref, o_ref):
    x = x_ref[...]
    o_ref[...] = (jnp.clip(x + 3.0, 0.0, 6.0) * (1.0 / 6.0)).astype(o_ref.dtype)


def hard_sigmoid(
    x: jax.Array,
    *,
    target_block_bytes: int = 8 * 1024 * 1024,
    small_bypass_bytes: int = 2 * 1024 * 1024,
) -> jax.Array:
    """Elementwise hard-sigmoid via a Pallas TPU kernel. Accepts any shape."""
    orig_shape = x.shape
    orig_dtype = x.dtype

    # ---- dtype policy -------------------------------------------------------
    if orig_dtype in (jnp.dtype(jnp.float32), jnp.dtype(jnp.bfloat16)):
        compute_dtype = orig_dtype          # native f32 / bf16 compute
        out_dtype = orig_dtype
    elif jnp.issubdtype(orig_dtype, jnp.floating):
        compute_dtype = jnp.float32         # f16/f64/fp8: compute in f32 on-chip
        out_dtype = orig_dtype
    else:
        compute_dtype = jnp.float32         # int/bool: torch .div(6.0) promotes
        out_dtype = jnp.float32

    n = x.size
    if n == 0:
        return x.astype(out_dtype)

    xc = x.astype(compute_dtype)
    itemsize = jnp.dtype(compute_dtype).itemsize

    # ---- small-input bypass: dispatch overhead dominates; let XLA fuse ------
    if n * itemsize < small_bypass_bytes:
        return _hard_sigmoid_jnp(xc).astype(out_dtype).reshape(orig_shape)

    # ---- tiling: lane-dense blocks, ~target_block_bytes each ----------------
    sublane = max(8, 32 // itemsize)            # 8 f32 / 16 bf16 / 32 i8
    total_rows = pl.cdiv(n, _LANES)             # logical 128-lane rows

    block_rows = max(sublane, target_block_bytes // (_LANES * itemsize))
    block_rows = _round_up(block_rows, sublane)
    block_rows = min(block_rows, _round_up(total_rows, sublane))
    # Ensure >= 2 grid steps so the "parallel" axis shards across both v7x TCs
    # instead of collapsing mid-size inputs onto a single core.
    if pl.cdiv(total_rows, block_rows) < 2 and total_rows > sublane:
        block_rows = _round_up(pl.cdiv(total_rows, 2), sublane)
    num_blocks = pl.cdiv(total_rows, block_rows)
    block_bytes = block_rows * _LANES * itemsize

    # ---- VMEM limit: in+out double-buffered + headroom, generation-aware ----
    try:
        phys_vmem = int(pltpu.get_tpu_info().vmem_capacity_bytes)
    except Exception:
        phys_vmem = 64 << 20                    # conservative (v7x per-TC)
    gen_cap = (64 << 20) if phys_vmem >= (96 << 20) else (48 << 20)
    vmem_limit = int(max(16 << 20, min(4 * block_bytes + (8 << 20), gen_cap)))

    compiler_params = pltpu.CompilerParams(
        dimension_semantics=("parallel",),
        vmem_limit_bytes=vmem_limit,
    )
    cost = pl.CostEstimate(
        flops=4 * n, transcendentals=0, bytes_accessed=2 * n * itemsize
    )

    if n % _LANES == 0:
        # Fast path: zero-copy reshape to a lane-dense (rows, 128) slab.
        x_op = xc.reshape(total_rows, _LANES)
        out = pl.pallas_call(
            _hard_sigmoid_kernel,
            out_shape=jax.ShapeDtypeStruct((total_rows, _LANES), compute_dtype),
            grid_spec=pltpu.PrefetchScalarGridSpec(
                num_scalar_prefetch=0,
                grid=(num_blocks,),
                in_specs=[pl.BlockSpec((block_rows, _LANES), lambda i: (i, 0))],
                out_specs=pl.BlockSpec((block_rows, _LANES), lambda i: (i, 0)),
            ),
            compiler_params=compiler_params,
            cost_estimate=cost,
        )(x_op)
    else:
        # Odd sizes: flat 1-D with a cdiv grid; Pallas masks the partial last
        # block on load/store, so there is no pad / slice HBM traffic.
        block_elems = block_rows * _LANES
        x_op = xc.reshape(n)
        out = pl.pallas_call(
            _hard_sigmoid_kernel,
            out_shape=jax.ShapeDtypeStruct((n,), compute_dtype),
            grid_spec=pltpu.PrefetchScalarGridSpec(
                num_scalar_prefetch=0,
                grid=(num_blocks,),
                in_specs=[pl.BlockSpec((block_elems,), lambda i: (i,))],
                out_specs=pl.BlockSpec((block_elems,), lambda i: (i,)),
            ),
            compiler_params=compiler_params,
            cost_estimate=cost,
        )(x_op)

    return out.reshape(orig_shape).astype(out_dtype)


if __name__ == "__main__":
    key = jax.random.PRNGKey(0)
    k1, k2, k3, k4 = jax.random.split(key, 4)

    # 1) Small NCHW activation (typical module usage) -> fused-XLA bypass path.
    x_small = jax.random.normal(k1, (2, 4, 16, 16), dtype=jnp.float32) * 4.0
    y_small = jax.block_until_ready(hard_sigmoid(x_small))
    ref_small = jnp.clip(x_small + 3.0, 0.0, 6.0) / 6.0
    assert y_small.shape == x_small.shape and y_small.dtype == x_small.dtype
    assert jnp.allclose(y_small, ref_small, atol=1e-6)

    # 2) Same small input forced through the Pallas kernel (bypass disabled):
    #    exercises the 2-D path and the min-two-grid-steps logic.
    y_small_k = jax.block_until_ready(hard_sigmoid(x_small, small_bypass_bytes=0))
    assert jnp.allclose(y_small_k, ref_small, atol=1e-6)

    # 3) Large f32 tensor: full-size 8 MiB blocks, 2 grid steps.
    x_big = jax.random.normal(k2, (8, 32, 128, 128), dtype=jnp.float32) * 4.0
    y_big = jax.block_until_ready(hard_sigmoid(x_big))
    assert jnp.allclose(y_big, jnp.clip(x_big + 3.0, 0.0, 6.0) / 6.0, atol=1e-6)

    # 4) bf16 I/O + bf16 in-kernel compute (looser tolerance vs f32 reference).
    x_bf = (jax.random.normal(k3, (4, 32, 128, 128), dtype=jnp.float32) * 4.0
            ).astype(jnp.bfloat16)
    y_bf = jax.block_until_ready(hard_sigmoid(x_bf))
    assert y_bf.dtype == jnp.bfloat16
    ref_bf = jnp.clip(x_bf.astype(jnp.float32) + 3.0, 0.0, 6.0) / 6.0
    assert jnp.allclose(y_bf.astype(jnp.float32), ref_bf, atol=2e-2)

    # 5) Large size NOT a multiple of 128: exercises the 1-D masked path
    #    (no pad / slice copies).
    x_odd = jax.random.normal(k4, (600001,), dtype=jnp.float32) * 4.0
    y_odd = jax.block_until_ready(hard_sigmoid(x_odd))
    assert y_odd.shape == x_odd.shape
    assert jnp.allclose(y_odd, jnp.clip(x_odd + 3.0, 0.0, 6.0) / 6.0, atol=1e-6)

    # 6) Integer input is promoted to float32 output (matches torch .div(6.0)).
    x_int = jnp.arange(-5, 11, dtype=jnp.int32).reshape(4, 4)
    y_int = jax.block_until_ready(hard_sigmoid(x_int))
    assert y_int.dtype == jnp.float32
    ref_int = jnp.clip(x_int.astype(jnp.float32) + 3.0, 0.0, 6.0) / 6.0
    assert jnp.allclose(y_int, ref_int, atol=1e-6)

    print("KERNEL_OK")
</pallas_src>

<mosaic_0001>
module attributes {stable_mosaic.version = 11 : i64} {
  func.func @_hard_sigmoid_kernel(%arg0: i32, %arg1: memref<8x128xf32, #tpu.memory_space<vmem>>, %arg2: memref<8x128xf32, #tpu.memory_space<vmem>>) attributes {dimension_semantics = [#tpu.dimension_semantics<parallel>], iteration_bounds = array<i64: 2>, scalar_prefetch = 0 : i64, scratch_operands = 0 : i64, tpu.core_type = #tpu.core_type<tc>, window_params = [{transform_indices = @transform_0, window_bounds = array<i64: 8, 128>}, {transform_indices = @transform_1, window_bounds = array<i64: 8, 128>}]} {
    %c0 = arith.constant 0 : index
    %c0_0 = arith.constant 0 : index
    %0 = vector.load %arg1[%c0, %c0_0] : memref<8x128xf32, #tpu.memory_space<vmem>>, vector<8x128xf32>
    %cst = arith.constant 3.000000e+00 : f32
    %1 = vector.broadcast %cst : f32 to vector<8x128xf32>
    %2 = arith.addf %0, %1 : vector<8x128xf32>
    %cst_1 = arith.constant 0.000000e+00 : f32
    %cst_2 = arith.constant 6.000000e+00 : f32
    %3 = vector.broadcast %cst_1 : f32 to vector<8x128xf32>
    %4 = arith.maximumf %3, %2 : vector<8x128xf32>
    %5 = vector.broadcast %cst_2 : f32 to vector<8x128xf32>
    %6 = arith.minimumf %5, %4 : vector<8x128xf32>
    %cst_3 = arith.constant 0.166666672 : f32
    %7 = vector.broadcast %cst_3 : f32 to vector<8x128xf32>
    %8 = arith.mulf %6, %7 : vector<8x128xf32>
    %c0_4 = arith.constant 0 : index
    %c0_5 = arith.constant 0 : index
    %9 = vector.load %arg2[%c0_4, %c0_5] : memref<8x128xf32, #tpu.memory_space<vmem>>, vector<8x128xf32>
    tpu.vector_store %arg2[%c0_4, %c0_5], %8 {strides = array<i32>} : memref<8x128xf32, #tpu.memory_space<vmem>>, vector<8x128xf32>,
    return
  }
  func.func @transform_0(%arg0: i32) -> (i32, i32) {
    %c0_i32 = arith.constant 0 : i32
    %c0_i32_0 = arith.constant 0 : i32
    return %arg0, %c0_i32 : i32, i32
  }
  func.func @transform_1(%arg0: i32) -> (i32, i32) {
    %c0_i32 = arith.constant 0 : i32
    %c0_i32_0 = arith.constant 0 : i32
    return %arg0, %c0_i32 : i32, i32
  }
}

</mosaic_0001>

<bundles_post_ra>
// kernel: tpu_custom_call.1
= control target key start
LH: loop header
LB: loop body
LE: loop exit
PB: predicated region body
PF: predicated region fallthrough
CT: control target
= control target key end

     0   :  { %6 = vsyncpa [#allocation3], 0  ;;  %s551_s0 = inlined_call_operand.hbm [shape: f32[16,128], index: 0, kind: input, shape index: {}]   ;;  %s552_s1 = inlined_call_operand.hbm [shape: f32[16,128], index: 1, kind: output, shape index: {}]  }
   0x1   :  { %8 = vsyncpa [#allocation3 + $0x1], 0 }
   0x2   :  { %9 = vsyncpa [#allocation4], 0 }
   0x3   :  { %11 = vsyncpa [#allocation4 + $0x1], 0  ;;  %s390_s6 = smov 0   ;;  %s392_s7 = smov 0  }
   0x4   :  { %s394_s8 = smov 0   ;;  %s396_s9 = smov 0  }
   0x5 LB: > { %s411_s10 = sadd.s32 4294967295, %s376_s9   ;;  %s222_s11 = sadd.s32 4294967294, %s376_s9   ;;  %s376_s9 = sphi %s396_s9, %s567_s9   ;;  %s372_s8 = sphi %s394_s8, %s566_s8   ;;  %s368_s7 = sphi %s392_s7, %s565_s7   ;;  %s364_s6 = sphi %s390_s6, %s564_s6  }
   0x6   : > { %s415_s12 = sadd.s32 1, %s376_s9   ;;  %s24_s13 = sadd.s32 1, %s372_s8 }
   0x7   : > { %s21_s14 = ssub.s32 %s376_s9, %s415_s12  ;;  %p31_p0 = scmp.ne.s32.totalorder %s372_s8, %s368_s7 }
   0x8   : > { %p22_p1 = scmp.eq.s32.totalorder %s21_s14, 0  ;;  %p32_p2 = scmp.eq.s32.totalorder %s376_s9, 0 }
   0x9   : > { %p37_p3 = scmp.ne.s32.totalorder %s368_s7, %s364_s6  ;;  %p38_p4 = scmp.eq.s32.totalorder %s411_s10, 0 }
   0xa   : > { %s427_s15 = scalar_select %p22_p1, %s372_s8, %s24_s13  }
   0xb   : > { %p429_p5 = por %p32_p2, %p31_p0  ;;  %p433_p6 = por %p38_p4, %p37_p3 }
   0xc   : > { %p61_p7 = scmp.eq.s32.totalorder %s411_s10, 1  ;;  %p67_p8 = scmp.eq.s32.totalorder %s222_s11, 1 }
   0xd   : > { %p246_p10 = scmp.lt.s32.totalorder %s376_s9, 2  ;;  %s87_s20 = sand.u32 1, %s372_s8  }
   0xe   : > { %p440_p11 = por %p61_p7, %p31_p0  ;;  %p444_p12 = por %p67_p8, %p37_p3 }
   0xf   : > { %s226_s21 = sshll.u32 %s376_s9, 7  ;;  %s225_s22 = sshll.u32 %s87_s20, 3 }
  0x10   : > { %s556_s18 = scalar_select %p440_p11, 1, 0 }
  0x11   : > { %s557_s19 = scalar_select %p444_p12, 1, 0 }
  0x12   : > { %s453_s25 = scalar_lea.hbm %s551_s0, %s226_s21  ;;  %s91_s26 = scalar_lea.vmem [#allocation2], %s225_s22 }
  0x13   : > { %s98_s27 = sshll.u32 %s91_s26, 4  ;;  %p457_p13 = pnand %p246_p10, %p429_p5  ;;  %s461_s27 = int_to_ptr.vmem [resolvable:$true] %s98_s27 }
  0x14   : > { %s88_s29 = scalar_lea.sflag [#allocation3], %s87_s20  ;;  %s280_s30 = scalar_lea.hbm %s453_s25, 128 }
  0x15   : > { %p281_p2 = scmp.ne.s32.totalorder %s453_s25, %s280_s30  ;;  %p282_p3 = pneg %p457_p13 }
  0x16   : > { %s285_s4 = scalar_lea.hbm %s551_s0, 256  ;;  %p286_p5 = scmp.lt.u32.totalorder %s453_s25, %s551_s0 }
  0x17   : > { %p283_p4 = pnand %p282_p3, %p281_p2  ;;  %p287_p8 = scmp.lt.u32.totalorder %s285_s4, %s280_s30 }
  0x18   : > { %p289_p9 = scmp.lt.u32.totalorder %s280_s30, %s453_s25 }
  0x19   : > { %p284_p7 = pneg %p283_p4  ;;  %p288_p10 = por %p287_p8, %p286_p5 }
  0x1b   : > { %p290_p0 = por %p289_p9, %p288_p10 }
  0x1d   : > { %p291_p1 = pnand %p290_p0, %p284_p7 }
  0x1f   : > { %294 = shalt.err (!%p291_p1)
}
  0x20   : > { %s295_s13 = scalar_lea.vmem %s461_s27, 128  ;;  %s378_s14 = smov [#allocation2]  }
  0x21   : > { %p296_p2 = scmp.ne.s32.totalorder %s461_s27, %s295_s13  ;;  %s300_s16 = sshll.u32 %s378_s14, 4  ;;  %s301_s16 = int_to_ptr.vmem [resolvable:$false] %s300_s16 }
  0x22   : > { %s302_s20 = scalar_lea.vmem %s301_s16, 256  ;;  %p303_p11 = scmp.lt.s32.totalorder %s461_s27, %s301_s16 }
  0x23   : > { %p298_p4 = pnand %p296_p2, %p282_p3  ;;  %p304_p5 = scmp.lt.s32.totalorder %s302_s20, %s295_s13 }
  0x25   : > { %p299_p12 = pneg %p298_p4  ;;  %p305_p8 = por %p304_p5, %p303_p11 }
  0x27   : > { %p306_p9 = pnand %p305_p8, %p299_p12 }
  0x29   : > { %309 = shalt.err (!%p306_p9)
}
  0x2a   : > { %241 = dma.hbm_to_vmem [thread:$0]  (!%p457_p13), %s453_s25, 128, %s461_s27, %s88_s29  }
  0x2b   : > { %p559_p0 = scmp.lt.s32.totalorder %s376_s9, 3  ;;  %p560_p1 = scmp.ge.s32.totalorder %s376_s9, 1 }
  0x2d   : > { %p104_p3 = pnand %p560_p1, %p559_p0 }
  0x2e   : > { %s495_s21 = sand.u32 (!%p104_p3), 1, %s368_s7  }
  0x2f   : > { %107 = sbr.rel (%p104_p3) target bundleno = 81 (0x51), region = 24  ;;  %s228_s22 = sshll.u32 (!%p104_p3), %s495_s21, 3 }
  0x30   : > { %s110_s23 = scalar_lea.sflag (!%p104_p3), [#allocation3], %s495_s21  ;;  %s113_s24 = scalar_lea.vmem (!%p104_p3), [#allocation2], %s228_s22 }
  0x36   : > { %355 = dma.done.wait (%p433_p6), %s110_s23, 128  }
  0x37   : > { %357 = vsyncadd (%p433_p6), %s110_s23, 4294967168  ;;  %v132_v0 = vld [vmem:[%s113_s24] sm:$0xff]  ;;  %s131_s25 = scalar_lea.vmem [#allocation5], %s228_s22  ;;  %s231_s27 = sshll.u32 %s411_s10, 7 }
  0x38   : > { %v133_v1 = vadd.f32 3.0, %v132_v0  ;;  %s152_s26 = sshll.u32 %s131_s25, 4  ;;  %s509_s17 = scalar_lea.hbm %s552_s1, %s231_s27  ;;  %s504_s26 = int_to_ptr.vmem [resolvable:$true] %s152_s26 }
  0x39   : > { %s139_s30 = scalar_lea.sflag [#allocation4], %s495_s21  ;;  %s310_s2 = scalar_lea.vmem %s504_s26, 128 }
  0x3a   : > { %v134_v2 = vmax.f32 %v133_v1, 0.0  ;;  %p311_p6 = scmp.ne.s32.totalorder %s504_s26, %s310_s2  ;;  %p561_p11 = scmp.ne.s32.totalorder %s556_s18, 0 }
  0x3b   : > { %s379_s10 = smov [#allocation5]  }
  0x3c   : > { %v135_v3 = vmin.f32 %v134_v2, 6.0  ;;  %p312_p12 = pnand %p311_p6, %p561_p11  ;;  %s314_s3 = sshll.u32 %s379_s10, 4  ;;  %s315_s3 = int_to_ptr.vmem [resolvable:$false] %s314_s3 }
  0x3d   : > { %s316_s4 = scalar_lea.vmem %s315_s3, 256  ;;  %p317_p7 = scmp.lt.s32.totalorder %s504_s26, %s315_s3 }
  0x3e   : > { %v136_v4 = vmul.f32 0.16666667, %v135_v3  ;;  %p313_p13 = pneg %p312_p12  ;;  %p318_p10 = scmp.lt.s32.totalorder %s316_s4, %s310_s2 }
  0x40   : > { %137 = vst [vmem:[%s131_s25] sm:$0xff] %v136_v4  ;;  %p319_p2 = por %p318_p10, %p317_p7 }
  0x42   : > { %p320_p4 = pnand %p319_p2, %p313_p13 }
  0x44   : > { %323 = shalt.err (!%p320_p4)
}
  0x45   : > { %s324_s5 = scalar_lea.hbm %s509_s17, 128  ;;  %s328_s14 = scalar_lea.hbm %s552_s1, 256 }
  0x46   : > { %p325_p5 = scmp.ne.s32.totalorder %s509_s17, %s324_s5  ;;  %p329_p0 = scmp.lt.u32.totalorder %s509_s17, %s552_s1 }
  0x47   : > { %p330_p1 = scmp.lt.u32.totalorder %s328_s14, %s324_s5  ;;  %p332_p6 = scmp.lt.u32.totalorder %s324_s5, %s509_s17 }
  0x48   : > { %p326_p8 = pnand %p325_p5, %p561_p11 }
  0x49   : > { %p331_p3 = por %p330_p1, %p329_p0 }
  0x4a   : > { %p327_p9 = pneg %p326_p8 }
  0x4b   : > { %p333_p12 = por %p332_p6, %p331_p3 }
  0x4d   : > { %p334_p13 = pnand %p333_p12, %p327_p9 }
  0x4f   : > { %337 = shalt.err (!%p334_p13)
}
  0x50   : > { %236 = dma.vmem_to_hbm [thread:$0]  (%p561_p11), %s504_s26, 128, %s509_s17, %s139_s30  }
  0x51 PF: > { %s164_s21 = sand.u32 1, %s364_s6   ;;  %p562_p7 = scmp.ne.s32.totalorder %s557_s19, 0 }
  0x52   : > { %p563_p10 = scmp.ge.s32.totalorder %s376_s9, 2  ;;  %s165_s22 = scalar_lea.sflag [#allocation4], %s164_s21 }
  0x54   : > { %p243_p2 = pnand %p563_p10, %p562_p7 }
  0x56   : > { %359 = dma.done.wait (!%p243_p2), %s165_s22, 128  }
  0x57   : > { %361 = vsyncadd (!%p243_p2), %s165_s22, 4294967168  ;;  %p14_p4 = scmp.ge.s32.totalorder %s415_s12, 4   ;;  %s564_s6 = smov %s368_s7 }
  0x58   : > { %s565_s7 = smov %s372_s8  ;;  %s566_s8 = smov %s427_s15 }
  0x59   : > { %s567_s9 = smov %s415_s12  ;;  %16 = sbr.rel (!%p14_p4) target bundleno = 5 (0x5), region = 69 }
  0x60   :  { %170 = vsyncpa [#allocation3], 1 }
  0x61   :  { %172 = vsyncpa [#allocation3 + $0x1], 1 }
  0x62   :  { %173 = vsyncpa [#allocation4], 1 }
  0x63   :  { %175 = vsyncpa [#allocation4 + $0x1], 1 }

</bundles_post_ra>
